<compile_context>
chip_gen: v5e
topology: v5e:2x2
jax: 0.10.0
libtpu: 0.0.40
codegen_flags: <defaults>
</compile_context>

<pallas_src>
import jax
import jax.numpy as jnp
from jax.experimental import pallas as pl
from jax.experimental.pallas import tpu as pltpu


SUBLANE = 8     # sublane width (second-to-last dim alignment)


def _round_up(x, m):
    return ((x + m - 1) // m) * m


# ---------------- fused kernel ----------------

def _make_fused_mlp_kernel(num_layers, compute_dtype):
    """Fused (Linear->ReLU)*(L-1) -> Linear -> log_softmax kernel.

    Kernel refs layout: (x_ref, w0, b0, w1, b1, ..., w_{L-1}, b_{L-1}, o_ref).
    All arrays are at their true (unpadded) shapes; Mosaic pads internally
    for the MXU as needed.
    """
    def kernel(*refs):
        x_ref = refs[0]
        o_ref = refs[-1]
        wb = refs[1:-1]

        # In-kernel f32 -> bf16 cast (avoids a pre-pass over x in HBM).
        h = x_ref[...].astype(compute_dtype)           # (tile_m, Din)
        for l in range(num_layers):
            w = wb[2 * l][...]                          # (din, dout) bf16
            b = wb[2 * l + 1][...]                      # (1, dout) f32
            z = jnp.dot(h, w, preferred_element_type=jnp.float32) + b
            if l < num_layers - 1:
                # ReLU (+ identity dropout), back to bf16 for the next MXU pass.
                h = jnp.maximum(z, 0.0).astype(compute_dtype)
            else:
                # Numerically stable log_softmax over the true output width.
                m = jnp.max(z, axis=-1, keepdims=True)
                s = z - m
                lse = jnp.log(jnp.sum(jnp.exp(s), axis=-1, keepdims=True))
                o_ref[...] = (s - lse).astype(o_ref.dtype)

    return kernel


# ---------------- wrapper ----------------

def mlp_forward(x, params, tile_m=512, compute_dtype=jnp.bfloat16):
    """Fused MLP forward.

    x: [N, in_channels] float32
    params: list of (W[in, out] f32, b[out] f32)  (already [in, out], i.e.
            transposed relative to torch's Linear [out, in]).
    """
    N, Din = x.shape
    num_layers = len(params)
    Dout = params[-1][0].shape[1]

    # Row tile: multiple of 8 sublanes.  For small N, shrink so the parallel
    # row axis still has >=2 grid steps (v7x has 2 TensorCores); the last
    # (ragged) tile is handled by Pallas' masked write-back.
    tile_m = max(SUBLANE, (int(tile_m) // SUBLANE) * SUBLANE)
    if N <= tile_m:
        tile_m = _round_up(max(SUBLANE, (N + 1) // 2), SUBLANE)
    grid = (pl.cdiv(N, tile_m),)

    # x passed untouched (f32, true Din).  Weights cast to bf16, biases f32
    # as (1, dout) rows; all blocks equal the full array shape so the
    # (8, 128) divisibility constraint does not apply.
    flat_inputs = [x]
    in_specs = [pl.BlockSpec((tile_m, Din), lambda i: (i, 0))]
    for (w, b) in params:
        din, dout = w.shape
        flat_inputs += [w.astype(compute_dtype),
                        b.astype(jnp.float32).reshape(1, dout)]
        in_specs += [pl.BlockSpec((din, dout), lambda i: (0, 0)),
                     pl.BlockSpec((1, dout), lambda i: (0, 0))]

    out = pl.pallas_call(
        _make_fused_mlp_kernel(num_layers, compute_dtype),
        out_shape=jax.ShapeDtypeStruct((N, Dout), jnp.float32),
        grid=grid,
        in_specs=in_specs,
        out_specs=pl.BlockSpec((tile_m, Dout), lambda i: (i, 0)),
        compiler_params=pltpu.CompilerParams(
            dimension_semantics=("parallel",)),
    )(*flat_inputs)

    return out


# ---------------- parameter init (deterministic, PyTorch-Linear style) ----------------

def init_mlp_params(key, in_channels, hidden_channels, out_channels, num_layers):
    dims = [in_channels] + [hidden_channels] * (num_layers - 1) + [out_channels]
    params = []
    for i in range(num_layers):
        din, dout = dims[i], dims[i + 1]
        key, kw, kb = jax.random.split(key, 3)
        bound = 1.0 / jnp.sqrt(din)
        # stored as [in, out] (transposed relative to torch's [out, in])
        w = jax.random.uniform(kw, (din, dout), jnp.float32, -bound, bound)
        b = jax.random.uniform(kb, (dout,), jnp.float32, -bound, bound)
        params.append((w, b))
    return params


# ---------------- reference (pure JAX, matching bf16 compute) ----------------

def mlp_reference(x, params, compute_dtype=jnp.bfloat16):
    h = x.astype(compute_dtype)
    for (w, b) in params[:-1]:
        z = jnp.dot(h, w.astype(compute_dtype),
                    preferred_element_type=jnp.float32) + b
        h = jnp.maximum(z, 0.0).astype(compute_dtype)
    w, b = params[-1]
    z = jnp.dot(h, w.astype(compute_dtype),
                preferred_element_type=jnp.float32) + b
    return jax.nn.log_softmax(z, axis=-1)


if __name__ == "__main__":
    key = jax.random.PRNGKey(0)
    N = 64                 # number of nodes
    in_channels = 16
    hidden_channels = 32
    out_channels = 8
    num_layers = 3
    dropout = 0.5          # unused at inference (identity)

    kx, kp = jax.random.split(key)
    x = jax.random.normal(kx, (N, in_channels), jnp.float32)
    params = init_mlp_params(kp, in_channels, hidden_channels, out_channels,
                             num_layers)

    out = mlp_forward(x, params, tile_m=512)
    out = jax.block_until_ready(out)

    ref = mlp_reference(x, params)
    assert out.shape == (N, out_channels)
    assert jnp.allclose(out, ref, atol=2e-3, rtol=2e-3), (
        float(jnp.max(jnp.abs(out - ref))))

    print("KERNEL_OK")
</pallas_src>

<mosaic_0001>
module attributes {stable_mosaic.version = 11 : i64} {
  func.func @kernel(%arg0: i32, %arg1: memref<32x16xf32, #tpu.memory_space<vmem>>, %arg2: memref<16x32xbf16, #tpu.memory_space<vmem>>, %arg3: memref<1x32xf32, #tpu.memory_space<vmem>>, %arg4: memref<32x32xbf16, #tpu.memory_space<vmem>>, %arg5: memref<1x32xf32, #tpu.memory_space<vmem>>, %arg6: memref<32x8xbf16, #tpu.memory_space<vmem>>, %arg7: memref<1x8xf32, #tpu.memory_space<vmem>>, %arg8: memref<32x8xf32, #tpu.memory_space<vmem>>) attributes {dimension_semantics = [#tpu.dimension_semantics<parallel>], iteration_bounds = array<i64: 2>, scalar_prefetch = 0 : i64, scratch_operands = 0 : i64, tpu.core_type = #tpu.core_type<tc>, window_params = [{transform_indices = @transform_0, window_bounds = array<i64: 32, 16>}, {pipeline_mode = #tpu.pipeline_mode<synchronous>, transform_indices = @transform_1, window_bounds = array<i64: 16, 32>}, {pipeline_mode = #tpu.pipeline_mode<synchronous>, transform_indices = @transform_2, window_bounds = array<i64: 1, 32>}, {pipeline_mode = #tpu.pipeline_mode<synchronous>, transform_indices = @transform_3, window_bounds = array<i64: 32, 32>}, {pipeline_mode = #tpu.pipeline_mode<synchronous>, transform_indices = @transform_4, window_bounds = array<i64: 1, 32>}, {pipeline_mode = #tpu.pipeline_mode<synchronous>, transform_indices = @transform_5, window_bounds = array<i64: 32, 8>}, {pipeline_mode = #tpu.pipeline_mode<synchronous>, transform_indices = @transform_6, window_bounds = array<i64: 1, 8>}, {transform_indices = @transform_7, window_bounds = array<i64: 32, 8>}]} {
    %c0 = arith.constant 0 : index
    %c0_0 = arith.constant 0 : index
    %0 = vector.load %arg1[%c0, %c0_0] : memref<32x16xf32, #tpu.memory_space<vmem>>, vector<32x16xf32>
    %1 = arith.truncf %0 : vector<32x16xf32> to vector<32x16xbf16>
    %c0_1 = arith.constant 0 : index
    %c0_2 = arith.constant 0 : index
    %2 = vector.load %arg2[%c0_1, %c0_2] : memref<16x32xbf16, #tpu.memory_space<vmem>>, vector<16x32xbf16>
    %c0_3 = arith.constant 0 : index
    %c0_4 = arith.constant 0 : index
    %3 = vector.load %arg3[%c0_3, %c0_4] : memref<1x32xf32, #tpu.memory_space<vmem>>, vector<1x32xf32>
    %cst = arith.constant dense<0.000000e+00> : vector<32x32xf32>
    %4 = tpu.matmul %1, %2, %cst {dimension_numbers = #tpu.dot_dimension_numbers<[1], [0], [0], [1], [0, 0, 1, 1], [], []>} : vector<32x16xbf16>, vector<16x32xbf16>, vector<32x32xf32> -> vector<32x32xf32>
    %5 = vector.broadcast %3 : vector<1x32xf32> to vector<32x32xf32>
    %6 = arith.addf %4, %5 : vector<32x32xf32>
    %cst_5 = arith.constant 0.000000e+00 : f32
    %7 = vector.broadcast %cst_5 : f32 to vector<32x32xf32>
    %8 = arith.maximumf %6, %7 : vector<32x32xf32>
    %9 = arith.truncf %8 : vector<32x32xf32> to vector<32x32xbf16>
    %c0_6 = arith.constant 0 : index
    %c0_7 = arith.constant 0 : index
    %10 = vector.load %arg4[%c0_6, %c0_7] : memref<32x32xbf16, #tpu.memory_space<vmem>>, vector<32x32xbf16>
    %c0_8 = arith.constant 0 : index
    %c0_9 = arith.constant 0 : index
    %11 = vector.load %arg5[%c0_8, %c0_9] : memref<1x32xf32, #tpu.memory_space<vmem>>, vector<1x32xf32>
    %cst_10 = arith.constant dense<0.000000e+00> : vector<32x32xf32>
    %12 = tpu.matmul %9, %10, %cst_10 {dimension_numbers = #tpu.dot_dimension_numbers<[1], [0], [0], [1], [0, 0, 1, 1], [], []>} : vector<32x32xbf16>, vector<32x32xbf16>, vector<32x32xf32> -> vector<32x32xf32>
    %13 = vector.broadcast %11 : vector<1x32xf32> to vector<32x32xf32>
    %14 = arith.addf %12, %13 : vector<32x32xf32>
    %cst_11 = arith.constant 0.000000e+00 : f32
    %15 = vector.broadcast %cst_11 : f32 to vector<32x32xf32>
    %16 = arith.maximumf %14, %15 : vector<32x32xf32>
    %17 = arith.truncf %16 : vector<32x32xf32> to vector<32x32xbf16>
    %c0_12 = arith.constant 0 : index
    %c0_13 = arith.constant 0 : index
    %18 = vector.load %arg6[%c0_12, %c0_13] : memref<32x8xbf16, #tpu.memory_space<vmem>>, vector<32x8xbf16>
    %c0_14 = arith.constant 0 : index
    %c0_15 = arith.constant 0 : index
    %19 = vector.load %arg7[%c0_14, %c0_15] : memref<1x8xf32, #tpu.memory_space<vmem>>, vector<1x8xf32>
    %cst_16 = arith.constant dense<0.000000e+00> : vector<32x8xf32>
    %20 = tpu.matmul %17, %18, %cst_16 {dimension_numbers = #tpu.dot_dimension_numbers<[1], [0], [0], [1], [0, 0, 1, 1], [], []>} : vector<32x32xbf16>, vector<32x8xbf16>, vector<32x8xf32> -> vector<32x8xf32>
    %21 = vector.broadcast %19 : vector<1x8xf32> to vector<32x8xf32>
    %22 = arith.addf %20, %21 : vector<32x8xf32>
    %cst_17 = arith.constant dense<0xFF800000> : vector<32xf32>
    %23 = vector.multi_reduction <maximumf>, %22, %cst_17 [1] : vector<32x8xf32> to vector<32xf32>
    %24 = vector.shape_cast %23 : vector<32xf32> to vector<32x1xf32>
    %25 = vector.broadcast %24 : vector<32x1xf32> to vector<32x8xf32>
    %26 = arith.subf %22, %25 : vector<32x8xf32>
    %27 = math.exp %26 : vector<32x8xf32>
    %cst_18 = arith.constant dense<0.000000e+00> : vector<32xf32>
    %28 = vector.multi_reduction <add>, %27, %cst_18 [1] : vector<32x8xf32> to vector<32xf32>
    %29 = vector.shape_cast %28 : vector<32xf32> to vector<32x1xf32>
    %30 = math.log %29 : vector<32x1xf32>
    %31 = vector.broadcast %30 : vector<32x1xf32> to vector<32x8xf32>
    %32 = arith.subf %26, %31 : vector<32x8xf32>
    %c0_19 = arith.constant 0 : index
    %c0_20 = arith.constant 0 : index
    %33 = vector.load %arg8[%c0_19, %c0_20] : memref<32x8xf32, #tpu.memory_space<vmem>>, vector<32x8xf32>
    tpu.vector_store %arg8[%c0_19, %c0_20], %32 {strides = array<i32>} : memref<32x8xf32, #tpu.memory_space<vmem>>, vector<32x8xf32>,
    return
  }
  func.func @transform_0(%arg0: i32) -> (i32, i32) {
    %c0_i32 = arith.constant 0 : i32
    %c0_i32_0 = arith.constant 0 : i32
    return %arg0, %c0_i32 : i32, i32
  }
  func.func @transform_1(%arg0: i32) -> (i32, i32) {
    %c0_i32 = arith.constant 0 : i32
    %c0_i32_0 = arith.constant 0 : i32
    %c0_i32_1 = arith.constant 0 : i32
    return %c0_i32, %c0_i32_0 : i32, i32
  }
  func.func @transform_2(%arg0: i32) -> (i32, i32) {
    %c0_i32 = arith.constant 0 : i32
    %c0_i32_0 = arith.constant 0 : i32
    %c0_i32_1 = arith.constant 0 : i32
    return %c0_i32, %c0_i32_0 : i32, i32
  }
  func.func @transform_3(%arg0: i32) -> (i32, i32) {
    %c0_i32 = arith.constant 0 : i32
    %c0_i32_0 = arith.constant 0 : i32
    %c0_i32_1 = arith.constant 0 : i32
    return %c0_i32, %c0_i32_0 : i32, i32
  }
  func.func @transform_4(%arg0: i32) -> (i32, i32) {
    %c0_i32 = arith.constant 0 : i32
    %c0_i32_0 = arith.constant 0 : i32
    %c0_i32_1 = arith.constant 0 : i32
    return %c0_i32, %c0_i32_0 : i32, i32
  }
  func.func @transform_5(%arg0: i32) -> (i32, i32) {
    %c0_i32 = arith.constant 0 : i32
    %c0_i32_0 = arith.constant 0 : i32
    %c0_i32_1 = arith.constant 0 : i32
    return %c0_i32, %c0_i32_0 : i32, i32
  }
  func.func @transform_6(%arg0: i32) -> (i32, i32) {
    %c0_i32 = arith.constant 0 : i32
    %c0_i32_0 = arith.constant 0 : i32
    %c0_i32_1 = arith.constant 0 : i32
    return %c0_i32, %c0_i32_0 : i32, i32
  }
  func.func @transform_7(%arg0: i32) -> (i32, i32) {
    %c0_i32 = arith.constant 0 : i32
    %c0_i32_0 = arith.constant 0 : i32
    return %arg0, %c0_i32 : i32, i32
  }
}

</mosaic_0001>

<bundles_post_ra>
// kernel: tpu_custom_call.1
= control target key start
LH: loop header
LB: loop body
LE: loop exit
PB: predicated region body
PF: predicated region fallthrough
CT: control target
= control target key end

     0   :  { %s658_s24 = smov 0   ;;  %s722_s0 = inlined_call_operand.vmem [shape: f32[64,16], index: 0, kind: input, shape index: {}]   ;;  %s723_s1 = inlined_call_operand.vmem [shape: bf16[16,32], index: 1, kind: input, shape index: {}]   ;;  %s724_s2 = inlined_call_operand.vmem [shape: f32[1,32], index: 2, kind: input, shape index: {}]   ;;  %s725_s3 = inlined_call_operand.vmem [shape: bf16[32,32], index: 3, kind: input, shape index: {}]   ;;  %s726_s4 = inlined_call_operand.vmem [shape: f32[1,32], index: 4, kind: input, shape index: {}]   ;;  %s727_s5 = inlined_call_operand.vmem [shape: bf16[32,8], index: 5, kind: input, shape index: {}]   ;;  %s728_s6 = inlined_call_operand.vmem [shape: f32[1,8], index: 6, kind: input, shape index: {}]   ;;  %s729_s7 = inlined_call_operand.vmem [shape: f32[64,8], index: 7, kind: output, shape index: {}]  }
   0x1 LB: > { %s539_s25 = sadd.s32 4294967295, %s616_s24   ;;  %p543_p0 = scmp.ge.s32.totalorder %s616_s24, 1  ;;  %s616_s24 = sphi %s658_s24, %s17_s24  }
   0x2   : > { %p238_p1 = scmp.lt.s32.totalorder %s616_s24, 3 }
   0x4   : > { %p239_p2 = pnand %p543_p0, %p238_p1 }
   0x5   : > { %s544_s28 = sshll.u32 (!%p239_p2), %s539_s25, 2 }
   0x6   : > { %242 = sbr.rel (%p239_p2) target bundleno = 718 (0x2ce), region = 48  ;;  %p271_p3 = scmp.lt.s32.totalorder (!%p239_p2), %s544_s28, 7 }
   0xb   : > { %v576_v0 = vld [vmem:[%s723_s1] sm:$0xff]  ;;  %s731_s28 = smov (!%p271_p3, %s544_s28), 7  ;;  %vm301_vm0 = vcmask 130048   ;;  %v578_v7 = vld [vmem:[%s725_s3 + $0x8] sm:$0xff]  ;;  %vm353_vm1 = vcmask 261120   ;;  %vm430_vm2 = vcmask 64512  }
   0xc   : > { %315 = vmatpush.bf16.msra.mxu0 %v576_v0  ;;  %s545_s29 = sshll.u32 %s731_s28, 3  ;;  %366 = vmatpush.bf16.msra.mxu1 %v578_v7  ;;  %v577_v8 = vld [vmem:[%s725_s3] sm:$0xff]  ;;  %v580_v24 = vld [vmem:[%s727_s5 + $0x8] sm:$0xff] }
   0xd   : > { %s274_s9 = scalar_lea.vmem %s722_s0, %s545_s29  ;;  %581 = vmatpush.bf16.msra.mxu3 %v578_v7  ;;  %v591_v10 = vld [vmem:[%s724_s2] ss:$0 sm:$0xff]  ;;  %417 = vmatpush.bf16.msra.mxu2 %v580_v24  ;;  %s280_s27 = scalar_lea.vmem %s729_s7, %s545_s29 }
   0xe   : > { %v283_v1 = vld [vmem:[%s274_s9] sm:$0xff]  ;;  %v284_v2 = vld [vmem:[%s274_s9 + $0x8] sm:$0xff]  ;;  %v285_v4 = vld [vmem:[%s274_s9 + $0x10] sm:$0xff] }
   0xf   : > { %v287_v3 = vpack.c.bf16 %v284_v2, %v283_v1  ;;  %v286_v5 = vld [vmem:[%s274_s9 + $0x18] sm:$0xff]  ;;  %v579_v25 = vld [vmem:[%s727_s5] sm:$0xff] }
  0x10   : > { %v288_v6 = vpack.c.bf16 %v286_v5, %v285_v4  ;;  %367 = vmatpush.bf16.msra.mxu1 %v577_v8  ;;  %v592_v27 = vld [vmem:[%s726_s4] ss:$0 sm:$0xff] }
  0x11   : > { %552 = vmatmul.msk.bf16.vlgmr.msra.gmra.mxu0 %vm301_vm0, %v287_v3  ;;  %582 = vmatpush.bf16.msra.mxu3 %v577_v8  ;;  %v593_v41 = vld [vmem:[%s728_s6] ss:$0 sm:$0xff] }
  0x12   : > { %418 = vmatpush.bf16.msra.mxu2 %v579_v25 }
  0x21   : > { %553 = vmatmul.msk.bf16.gmra.mxu0 %vm301_vm0, %v288_v6 }
  0x8e   : > { %v317_v9 = vpop.f32.mrf.mxu0 }
  0x8f   : > { %v318_v11 = vadd.f32 %v591_v10, %v317_v9 }
  0x91   : > { %v327_v14 = vmax.f32 %v318_v11, 0.0 }
  0x96   : > { %v319_v12 = vpop.f32.mrf.mxu0 }
  0x97   : > { %v320_v13 = vadd.f32 %v591_v10, %v319_v12 }
  0x99   : > { %v328_v15 = vmax.f32 %v320_v13, 0.0 }
  0x9b   : > { %v331_v16 = vpack.c.bf16 %v328_v15, %v327_v14 }
  0x9d   : > { %562 = vmatmul.msk.bf16.vlgmr.msra.gmra.mxu1 %vm353_vm1, %v331_v16 }
  0x9e   : > { %v322_v17 = vpop.f32.mrf.mxu0 }
  0x9f   : > { %v323_v18 = vadd.f32 %v591_v10, %v322_v17 }
  0xa1   : > { %v329_v21 = vmax.f32 %v323_v18, 0.0 }
  0xa6   : > { %v324_v19 = vpop.f32.mrf.mxu0 }
  0xa7   : > { %v325_v20 = vadd.f32 %v591_v10, %v324_v19 }
  0xa9   : > { %v330_v22 = vmax.f32 %v325_v20, 0.0 }
  0xab   : > { %v332_v23 = vpack.c.bf16 %v330_v22, %v329_v21 }
  0xad   : > { %563 = vmatmul.msk.bf16.vlgmr.msra.gmra.mxu3 %vm353_vm1, %v332_v23 }
 0x11a   : > { %v369_v26 = vpop.f32.mrf.mxu1 }
 0x11b   : > { %v370_v28 = vadd.f32 %v592_v27, %v369_v26 }
 0x11d   : > { %v379_v31 = vmax.f32 %v370_v28, 0.0 }
 0x122   : > { %v371_v29 = vpop.f32.mrf.mxu1 }
 0x123   : > { %v372_v30 = vadd.f32 %v592_v27, %v371_v29 }
 0x125   : > { %v380_v32 = vmax.f32 %v372_v30, 0.0 }
 0x127   : > { %v383_v33 = vpack.c.bf16 %v380_v32, %v379_v31 }
 0x129   : > { %572 = vmatmul.msk.bf16.vlgmr.msra.gmra.mxu2 %vm353_vm1, %v383_v33 }
 0x130   : > { %v374_v34 = vpop.f32.mrf.mxu3 }
 0x131   : > { %v375_v35 = vadd.f32 %v592_v27, %v374_v34 }
 0x133   : > { %v381_v38 = vmax.f32 %v375_v35, 0.0 }
 0x138   : > { %v376_v36 = vpop.f32.mrf.mxu3 }
 0x139   : > { %v377_v37 = vadd.f32 %v592_v27, %v376_v36 }
 0x13b   : > { %v382_v39 = vmax.f32 %v377_v37, 0.0 }
 0x13d   : > { %v384_v40 = vpack.c.bf16 %v382_v39, %v381_v38 }
 0x13f   : > { %573 = vmatmul.msk.bf16.gmra.mxu2 %vm353_vm1, %v384_v40 }
 0x1ac   : > { %v420_v42 = vpop.f32.mrf.mxu2 }
 0x1ad   : > { %v421_v43 = vadd.f32 %v593_v41, %v420_v42 }
 0x1af   : > { %v431_v44 = vsel %vm430_vm2, %v421_v43, -inf }
 0x1b0   : > { %432 = vmax.xlane.f32.xlu0 %v431_v44 }
 0x1b4   : > { %v422_v45 = vpop.f32.mrf.mxu2 }
 0x1b5   : > { %v423_v46 = vadd.f32 %v593_v41, %v422_v45 }
 0x1b7   : > { %v434_v47 = vsel %vm430_vm2, %v423_v46, -inf }
 0x1b8   : > { %435 = vmax.xlane.f32.xlu0 %v434_v47 }
 0x1c2   : > { %v425_v48 = vpop.f32.mrf.mxu2 }
 0x1c3   : > { %v426_v49 = vadd.f32 %v593_v41, %v425_v48 }
 0x1c5   : > { %v437_v50 = vsel %vm430_vm2, %v426_v49, -inf }
 0x1c6   : > { %438 = vmax.xlane.f32.xlu1 %v437_v50 }
 0x1ca   : > { %v427_v51 = vpop.f32.mrf.mxu2 }
 0x1cb   : > { %v428_v52 = vadd.f32 %v593_v41, %v427_v51 }
 0x1cd   : > { %v440_v53 = vsel %vm430_vm2, %v428_v52, -inf }
 0x1ce   : > { %441 = vmax.xlane.f32.xlu1 %v440_v53 }
 0x223   : > { %v433_v54 = vpop.xlane.xlu0 %432 }
 0x224   : > { %v443_v55 = vsub.f32 %v421_v43, %v433_v54 }
 0x226   : > { %v447_v56 = vmul.f32 1.442695, %v443_v55 }
 0x228   : > { %594 = vpow2.f32 %v447_v56 }
 0x22b   : > { %v436_v57 = vpop.xlane.xlu0 %435 }
 0x22c   : > { %v444_v58 = vsub.f32 %v423_v46, %v436_v57 }
 0x22e   : > { %v595_v59 = vpop.eup %594  ;;  %v449_v60 = vmul.f32 1.442695, %v444_v58 }
 0x22f   : > { %v455_v61 = vsel %vm430_vm2, %v595_v59, 0.0 }
 0x230   : > { %596 = vpow2.f32 %v449_v60  ;;  %456 = vadd.xlane.f32.xlu2 %v455_v61 }
 0x236   : > { %v597_v62 = vpop.eup %596 }
 0x237   : > { %v458_v63 = vsel %vm430_vm2, %v597_v62, 0.0 }
 0x238   : > { %459 = vadd.xlane.f32.xlu2 %v458_v63 }
 0x239   : > { %v439_v0 = vpop.xlane.xlu1 %438 }
 0x23a   : > { %v445_v1 = vsub.f32 %v426_v49, %v439_v0 }
 0x23c   : > { %v451_v2 = vmul.f32 1.442695, %v445_v1 }
 0x23e   : > { %598 = vpow2.f32 %v451_v2 }
 0x241   : > { %v442_v3 = vpop.xlane.xlu1 %441 }
 0x242   : > { %v446_v4 = vsub.f32 %v428_v52, %v442_v3 }
 0x244   : > { %v599_v5 = vpop.eup %598  ;;  %v453_v6 = vmul.f32 1.442695, %v446_v4 }
 0x245   : > { %v461_v7 = vsel %vm430_vm2, %v599_v5, 0.0 }
 0x246   : > { %600 = vpow2.f32 %v453_v6  ;;  %462 = vadd.xlane.f32.xlu0 %v461_v7 }
 0x24c   : > { %v601_v8 = vpop.eup %600 }
 0x24d   : > { %v464_v9 = vsel %vm430_vm2, %v601_v8, 0.0 }
 0x24e   : > { %465 = vadd.xlane.f32.xlu1 %v464_v9 }
 0x2a3   : > { %v457_v10 = vpop.xlane.xlu2 %456 }
 0x2a4   : > { %602 = vlog2.f32 %v457_v10 }
 0x2aa   : > { %v603_v11 = vpop.eup %602 }
 0x2ab   : > { %v468_v12 = vmul.f32 0.6931472, %v603_v11  ;;  %v460_v13 = vpop.xlane.xlu2 %459 }
 0x2ac   : > { %604 = vlog2.f32 %v460_v13 }
 0x2ad   : > { %v475_v14 = vsub.f32 %v443_v55, %v468_v12 }
 0x2af   : > { %479 = vst.msk [vmem:[%s280_s27] sm:$0xff] %vm430_vm2, %v475_v14 }
 0x2b2   : > { %v605_v15 = vpop.eup %604 }
 0x2b3   : > { %v470_v16 = vmul.f32 0.6931472, %v605_v15 }
 0x2b5   : > { %v476_v17 = vsub.f32 %v444_v58, %v470_v16 }
 0x2b7   : > { %480 = vst.msk [vmem:[%s280_s27 + $0x8] sm:$0xff] %vm430_vm2, %v476_v17 }
 0x2b9   : > { %v463_v18 = vpop.xlane.xlu0 %462 }
 0x2ba   : > { %606 = vlog2.f32 %v463_v18 }
 0x2c0   : > { %v607_v19 = vpop.eup %606 }
 0x2c1   : > { %v472_v20 = vmul.f32 0.6931472, %v607_v19  ;;  %v466_v21 = vpop.xlane.xlu1 %465 }
 0x2c2   : > { %608 = vlog2.f32 %v466_v21 }
 0x2c3   : > { %v477_v22 = vsub.f32 %v445_v1, %v472_v20 }
 0x2c5   : > { %481 = vst.msk [vmem:[%s280_s27 + $0x10] sm:$0xff] %vm430_vm2, %v477_v22 }
 0x2c8   : > { %v609_v23 = vpop.eup %608 }
 0x2c9   : > { %v474_v24 = vmul.f32 0.6931472, %v609_v23 }
 0x2cb   : > { %v478_v25 = vsub.f32 %v446_v4, %v474_v24 }
 0x2cd   : > { %482 = vst.msk [vmem:[%s280_s27 + $0x18] sm:$0xff] %vm430_vm2, %v478_v25 }
 0x2ce PF: > { %s17_s24 = sadd.s32 1, %s616_s24  }
 0x2cf   : > { %p14_p4 = scmp.ge.s32.totalorder %s17_s24, 4  }
 0x2d1   :  { %16 = sbr.rel (!%p14_p4) target bundleno = 1 (0x1), region = 78 }

</bundles_post_ra>
